<compile_context>
chip_gen: v6e
topology: v6e:2x2x1
jax: 0.10.0
libtpu: 0.0.40
codegen_flags: <defaults>
</compile_context>

<pallas_src>
import jax
import jax.numpy as jnp
from jax.experimental import pallas as pl
from jax.experimental.pallas import tpu as pltpu


def mlp_kernel(x_ref, w1_ref, b1_ref, w2_ref, b2_ref, o_ref):
    # x_ref : (2, TB)    batch on lanes
    # w1_ref: (128, 2)   PyTorch fc1.weight (out, in)
    # b1_ref: (128, 1)
    # w2_ref: (128, 1)   fc2.weight reshaped to a column
    # b2_ref: (1, 1)     SMEM scalar
    # o_ref : (1, TB)
    x0 = x_ref[0:1, :]          # (1, TB)
    x1 = x_ref[1:2, :]          # (1, TB)
    w1c0 = w1_ref[:, 0:1]       # (128, 1)
    w1c1 = w1_ref[:, 1:2]       # (128, 1)

    # fc1 as two VPU broadcast FMAs (outer products); K=2 -> MXU not worth it.
    h = w1c0 * x0 + w1c1 * x1 + b1_ref[...]      # (128, TB)
    h = jnp.maximum(h, 0.0)                      # ReLU

    # fc2 as elementwise multiply + sublane reduce; N=1 -> MXU not worth it.
    out = jnp.sum(h * w2_ref[...], axis=0, keepdims=True)   # (1, TB)
    o_ref[...] = out + b2_ref[0, 0]


def net_a_forward(x, w1, b1, w2, b2, *, tb_max=1024):
    """x: (B, 2) f32; w1: (128, 2); b1: (128,); w2: (1, 128); b2: (1,).

    Weights follow PyTorch nn.Linear convention (out_features, in_features).
    Returns (B, 1) f32.
    """
    B = x.shape[0]
    H = w1.shape[0]  # 128

    # Batch tile: multiple of 128 lanes, capped at tb_max (keeps the (128,TB)
    # hidden intermediate + double-buffered streams well under VMEM limits).
    if B >= tb_max:
        TB = tb_max
    else:
        TB = max(128, pl.cdiv(B, 128) * 128)
    B_pad = pl.cdiv(B, TB) * TB

    # Lane-dense layout: batch on lanes.
    x_t = x.T                                    # (2, B)
    if B_pad != B:
        x_t = jnp.pad(x_t, ((0, 0), (0, B_pad - B)))
    b1_c = b1.reshape(H, 1)                      # (128, 1)
    w2_c = w2.reshape(H, 1)                      # (128, 1) column of fc2.weight
    b2_s = b2.reshape(1, 1).astype(jnp.float32)  # (1, 1) SMEM scalar

    grid = (B_pad // TB,)

    cost = pl.CostEstimate(
        flops=int(B_pad) * (2 * 2 * H + 2 * H),          # fc1 FMAs + fc2 reduce
        transcendentals=0,
        bytes_accessed=int(B_pad) * (2 + 1) * 4 + (H * 2 + H + H + 1) * 4,
    )

    out = pl.pallas_call(
        mlp_kernel,
        out_shape=jax.ShapeDtypeStruct((1, B_pad), jnp.float32),
        grid=grid,
        in_specs=[
            pl.BlockSpec((2, TB), lambda i: (0, i)),        # x tile (streamed)
            pl.BlockSpec((H, 2), lambda i: (0, 0)),         # w1 (resident)
            pl.BlockSpec((H, 1), lambda i: (0, 0)),         # b1 (resident)
            pl.BlockSpec((H, 1), lambda i: (0, 0)),         # w2 col (resident)
            pl.BlockSpec(memory_space=pltpu.MemorySpace.SMEM),  # b2 scalar
        ],
        out_specs=pl.BlockSpec((1, TB), lambda i: (0, i)),  # lane-dense output
        compiler_params=pltpu.CompilerParams(
            dimension_semantics=("parallel",),
        ),
        cost_estimate=cost,
    )(x_t, w1, b1_c, w2_c, b2_s)

    return out[:, :B].T                                     # (B, 1)


def init_params(key):
    """Deterministic parameter init matching nn.Linear shapes."""
    k1, k2, k3, k4 = jax.random.split(key, 4)
    # PyTorch nn.Linear: weight (out, in), bias (out,)
    w1 = jax.random.uniform(k1, (128, 2), jnp.float32, -0.5, 0.5)
    b1 = jax.random.uniform(k2, (128,), jnp.float32, -0.5, 0.5)
    w2 = jax.random.uniform(k3, (1, 128), jnp.float32, -0.5, 0.5)
    b2 = jax.random.uniform(k4, (1,), jnp.float32, -0.5, 0.5)
    return w1, b1, w2, b2


if __name__ == "__main__":
    key = jax.random.PRNGKey(0)
    k_params, k_x = jax.random.split(key)

    w1, b1, w2, b2 = init_params(k_params)

    # Small deterministic batch.
    B = 8
    x = jax.random.normal(k_x, (B, 2), jnp.float32)

    out = net_a_forward(x, w1, b1, w2, b2)
    out = jax.block_until_ready(out)

    # Reference check in plain JAX (same math as the PyTorch module).
    ref = jnp.maximum(x @ w1.T + b1, 0.0) @ w2.T + b2
    assert out.shape == (B, 1)
    assert jnp.allclose(out, ref, atol=1e-5, rtol=1e-5)

    # Also exercise a batch that is not a multiple of the tile size.
    B2 = 300
    x2 = jax.random.normal(jax.random.PRNGKey(1), (B2, 2), jnp.float32)
    out2 = jax.block_until_ready(net_a_forward(x2, w1, b1, w2, b2))
    ref2 = jnp.maximum(x2 @ w1.T + b1, 0.0) @ w2.T + b2
    assert out2.shape == (B2, 1)
    assert jnp.allclose(out2, ref2, atol=1e-5, rtol=1e-5)

    print("KERNEL_OK")
</pallas_src>

<mosaic_0001>
module attributes {stable_mosaic.version = 11 : i64} {
  func.func @mlp_kernel(%arg0: i32, %arg1: memref<2x128xf32, #tpu.memory_space<vmem>>, %arg2: memref<128x2xf32, #tpu.memory_space<vmem>>, %arg3: memref<128x1xf32, #tpu.memory_space<vmem>>, %arg4: memref<128x1xf32, #tpu.memory_space<vmem>>, %arg5: memref<1x1xf32, #tpu.memory_space<smem>>, %arg6: memref<1x128xf32, #tpu.memory_space<vmem>>) attributes {dimension_semantics = [#tpu.dimension_semantics<parallel>], iteration_bounds = array<i64: 1>, scalar_prefetch = 0 : i64, scratch_operands = 0 : i64, tpu.core_type = #tpu.core_type<tc>, window_params = [{transform_indices = @transform_0, window_bounds = array<i64: 2, 128>}, {pipeline_mode = #tpu.pipeline_mode<synchronous>, transform_indices = @transform_1, window_bounds = array<i64: 128, 2>}, {pipeline_mode = #tpu.pipeline_mode<synchronous>, transform_indices = @transform_2, window_bounds = array<i64: 128, 1>}, {pipeline_mode = #tpu.pipeline_mode<synchronous>, transform_indices = @transform_3, window_bounds = array<i64: 128, 1>}, {transform_indices = @transform_4, window_bounds = array<i64: 1, 1>}, {transform_indices = @transform_5, window_bounds = array<i64: 1, 128>}]} {
    %c0 = arith.constant 0 : index
    %c0_0 = arith.constant 0 : index
    %0 = vector.load %arg1[%c0, %c0_0] : memref<2x128xf32, #tpu.memory_space<vmem>>, vector<1x128xf32>
    %c1 = arith.constant 1 : index
    %c0_1 = arith.constant 0 : index
    %1 = vector.load %arg1[%c1, %c0_1] : memref<2x128xf32, #tpu.memory_space<vmem>>, vector<1x128xf32>
    %c0_2 = arith.constant 0 : index
    %c0_3 = arith.constant 0 : index
    %2 = vector.load %arg2[%c0_2, %c0_3] : memref<128x2xf32, #tpu.memory_space<vmem>>, vector<128x1xf32>
    %c0_4 = arith.constant 0 : index
    %c1_5 = arith.constant 1 : index
    %3 = vector.load %arg2[%c0_4, %c1_5] : memref<128x2xf32, #tpu.memory_space<vmem>>, vector<128x1xf32>
    %4 = vector.broadcast %2 : vector<128x1xf32> to vector<128x128xf32>
    %5 = vector.broadcast %0 : vector<1x128xf32> to vector<128x128xf32>
    %6 = arith.mulf %4, %5 : vector<128x128xf32>
    %7 = vector.broadcast %3 : vector<128x1xf32> to vector<128x128xf32>
    %8 = vector.broadcast %1 : vector<1x128xf32> to vector<128x128xf32>
    %9 = arith.mulf %7, %8 : vector<128x128xf32>
    %10 = arith.addf %6, %9 : vector<128x128xf32>
    %c0_6 = arith.constant 0 : index
    %c0_7 = arith.constant 0 : index
    %11 = vector.load %arg3[%c0_6, %c0_7] : memref<128x1xf32, #tpu.memory_space<vmem>>, vector<128x1xf32>
    %12 = vector.broadcast %11 : vector<128x1xf32> to vector<128x128xf32>
    %13 = arith.addf %10, %12 : vector<128x128xf32>
    %cst = arith.constant 0.000000e+00 : f32
    %14 = vector.broadcast %cst : f32 to vector<128x128xf32>
    %15 = arith.maximumf %13, %14 : vector<128x128xf32>
    %c0_8 = arith.constant 0 : index
    %c0_9 = arith.constant 0 : index
    %16 = vector.load %arg4[%c0_8, %c0_9] : memref<128x1xf32, #tpu.memory_space<vmem>>, vector<128x1xf32>
    %17 = vector.broadcast %16 : vector<128x1xf32> to vector<128x128xf32>
    %18 = arith.mulf %15, %17 : vector<128x128xf32>
    %cst_10 = arith.constant dense<0.000000e+00> : vector<128xf32>
    %19 = vector.multi_reduction <add>, %18, %cst_10 [0] : vector<128x128xf32> to vector<128xf32>
    %20 = vector.shape_cast %19 : vector<128xf32> to vector<1x128xf32>
    %c0_11 = arith.constant 0 : index
    %c0_12 = arith.constant 0 : index
    %21 = memref.load %arg5[%c0_11, %c0_12] : memref<1x1xf32, #tpu.memory_space<smem>>
    %22 = vector.broadcast %21 : f32 to vector<1x128xf32>
    %23 = arith.addf %20, %22 : vector<1x128xf32>
    %c0_13 = arith.constant 0 : index
    %c0_14 = arith.constant 0 : index
    %24 = vector.load %arg6[%c0_13, %c0_14] : memref<1x128xf32, #tpu.memory_space<vmem>>, vector<1x128xf32>
    tpu.vector_store %arg6[%c0_13, %c0_14], %23 {strides = array<i32>} : memref<1x128xf32, #tpu.memory_space<vmem>>, vector<1x128xf32>,
    return
  }
  func.func @transform_0(%arg0: i32) -> (i32, i32) {
    %c0_i32 = arith.constant 0 : i32
    %c0_i32_0 = arith.constant 0 : i32
    return %c0_i32, %arg0 : i32, i32
  }
  func.func @transform_1(%arg0: i32) -> (i32, i32) {
    %c0_i32 = arith.constant 0 : i32
    %c0_i32_0 = arith.constant 0 : i32
    %c0_i32_1 = arith.constant 0 : i32
    return %c0_i32, %c0_i32_0 : i32, i32
  }
  func.func @transform_2(%arg0: i32) -> (i32, i32) {
    %c0_i32 = arith.constant 0 : i32
    %c0_i32_0 = arith.constant 0 : i32
    %c0_i32_1 = arith.constant 0 : i32
    return %c0_i32, %c0_i32_0 : i32, i32
  }
  func.func @transform_3(%arg0: i32) -> (i32, i32) {
    %c0_i32 = arith.constant 0 : i32
    %c0_i32_0 = arith.constant 0 : i32
    %c0_i32_1 = arith.constant 0 : i32
    return %c0_i32, %c0_i32_0 : i32, i32
  }
  func.func @transform_4(%arg0: i32) -> (i32, i32) {
    %c0_i32 = arith.constant 0 : i32
    %c0_i32_0 = arith.constant 0 : i32
    %c0_i32_1 = arith.constant 0 : i32
    return %c0_i32, %c0_i32_0 : i32, i32
  }
  func.func @transform_5(%arg0: i32) -> (i32, i32) {
    %c0_i32 = arith.constant 0 : i32
    %c0_i32_0 = arith.constant 0 : i32
    return %c0_i32, %arg0 : i32, i32
  }
}

</mosaic_0001>

<bundles_post_ra>
// kernel: tpu_custom_call.1
= control target key start
LH: loop header
LB: loop body
LE: loop exit
PB: predicated region body
PF: predicated region fallthrough
CT: control target
= control target key end

     0   :  { %v551_v2 = vmov 1   ;;  %v552_v3 = vmov 0   ;;  %s818_s0 = inlined_call_operand.vmem [shape: f32[2,128], index: 0, kind: input, shape index: {}]   ;;  %s819_s1 = inlined_call_operand.vmem [shape: f32[128,2], index: 1, kind: input, shape index: {}]   ;;  %s820_s2 = inlined_call_operand.vmem [shape: f32[128,1], index: 2, kind: input, shape index: {}]   ;;  %s821_s3 = inlined_call_operand.vmem [shape: f32[128,1], index: 3, kind: input, shape index: {}]   ;;  %s822_s4 = inlined_call_operand.<no memory space> [shape: f32[1,1], index: 4, kind: input, shape index: {}]   ;;  %s823_s5 = inlined_call_operand.hbm [shape: f32[1,128], index: 5, kind: output, shape index: {}]  }
   0x1   :  { %v26_v0 = vld [vmem:[%s819_s1 + $0x10] sm:$0xff]  ;;  %v24_v1 = vld [vmem:[%s819_s1] sm:$0xff]  ;;  %525 = vset.pattern.permute.xlu0 %v551_v2  ;;  %524 = vset.pattern.permute.xlu1 %v552_v3  ;;  %v27_v4 = vld [vmem:[%s819_s1 + $0x18] sm:$0xff] }
   0x2   :  { %52 = vperm.xlu1 %524, %v26_v0   ;;  %141 = vperm.xlu0 %525, %v24_v1   ;;  %v29_v5 = vld [vmem:[%s819_s1 + $0x28] sm:$0xff]  ;;  %v31_v6 = vld [vmem:[%s819_s1 + $0x38] sm:$0xff] }
   0x3   :  { %v33_v7 = vld [vmem:[%s819_s1 + $0x48] sm:$0xff] }
   0x6   :  { %57 = vperm.xlu1 %524, %v27_v4   ;;  %153 = vperm.xlu0 %525, %v27_v4  }
   0xa   :  { %67 = vperm.xlu1 %524, %v29_v5   ;;  %161 = vperm.xlu0 %525, %v29_v5  }
   0xe   :  { %77 = vperm.xlu1 %524, %v31_v6   ;;  %169 = vperm.xlu0 %525, %v31_v6  }
   0xf   :  { %11 = vsyncpa [#allocation4], 0  ;;  %v35_v8 = vld [vmem:[%s819_s1 + $0x58] sm:$0xff]  ;;  %v37_v9 = vld [vmem:[%s819_s1 + $0x68] sm:$0xff]  ;;  %s553_s14 = smov [#allocation3]  }
  0x10   :  { %v39_v10 = vld [vmem:[%s819_s1 + $0x78] sm:$0xff]  ;;  %v25_v11 = vld [vmem:[%s819_s1 + $0x8] sm:$0xff]  ;;  %v28_v12 = vld [vmem:[%s819_s1 + $0x20] sm:$0xff]  ;;  %s511_s15 = sshll.u32 %s553_s14, 4  ;;  %s512_s15 = int_to_ptr.vmem [resolvable:$true] %s511_s15 }
  0x11   :  { %v30_v13 = vld [vmem:[%s819_s1 + $0x30] sm:$0xff]  ;;  %v32_v14 = vld [vmem:[%s819_s1 + $0x40] sm:$0xff]  ;;  %v241_v18 = vld [vmem:[%s820_s2 + $0x8] sm:$0xff]  ;;  %s529_s16 = scalar_lea.vmem %s512_s15, 16  ;;  %s533_s17 = scalar_lea.vmem %s512_s15, 32 }
  0x12   :  { %87 = vperm.xlu1 %524, %v33_v7   ;;  %177 = vperm.xlu0 %525, %v33_v7   ;;  %v34_v15 = vld [vmem:[%s819_s1 + $0x50] sm:$0xff]  ;;  %v36_v16 = vld [vmem:[%s819_s1 + $0x60] sm:$0xff]  ;;  %v369_v22 = vld [vmem:[%s821_s3 + $0x8] sm:$0xff]  ;;  %p530_p0 = scmp.ne.s32.totalorder %s512_s15, %s529_s16  ;;  %p534_p1 = scmp.lt.s32.totalorder %s512_s15, %s512_s15 }
  0x13   :  { %v38_v17 = vld [vmem:[%s819_s1 + $0x70] sm:$0xff]  ;;  %v240_v19 = vld [vmem:[%s820_s2] sm:$0xff]  ;;  %v243_v23 = vld [vmem:[%s820_s2 + $0x18] sm:$0xff]  ;;  %p535_p2 = scmp.lt.s32.totalorder %s533_s17, %s529_s16 }
  0x14   :  { %v244_v20 = vld [vmem:[%s820_s2 + $0x20] sm:$0xff]  ;;  %v242_v21 = vld [vmem:[%s820_s2 + $0x10] sm:$0xff]  ;;  %v245_v24 = vld [vmem:[%s820_s2 + $0x28] sm:$0xff] }
  0x15   :  { %v368_v25 = vld [vmem:[%s821_s3] sm:$0xff]  ;;  %v246_v26 = vld [vmem:[%s820_s2 + $0x30] sm:$0xff]  ;;  %v247_v28 = vld [vmem:[%s820_s2 + $0x38] sm:$0xff]  ;;  %p536_p3 = por %p535_p2, %p534_p1 }
  0x16   :  { %97 = vperm.xlu1 %524, %v35_v8   ;;  %185 = vperm.xlu0 %525, %v35_v8   ;;  %v370_v27 = vld [vmem:[%s821_s3 + $0x10] sm:$0xff]  ;;  %v371_v29 = vld [vmem:[%s821_s3 + $0x18] sm:$0xff]  ;;  %v248_v30 = vld [vmem:[%s820_s2 + $0x40] sm:$0xff] }
  0x17   :  { %v372_v31 = vld [vmem:[%s821_s3 + $0x20] sm:$0xff]  ;;  %v249_v32 = vld [vmem:[%s820_s2 + $0x48] sm:$0xff]  ;;  %v250_v34 = vld [vmem:[%s820_s2 + $0x50] sm:$0xff]  ;;  %p537_p4 = pnand %p536_p3, %p530_p0 }
  0x18   :  { %v373_v33 = vld [vmem:[%s821_s3 + $0x28] sm:$0xff]  ;;  %v374_v35 = vld [vmem:[%s821_s3 + $0x30] sm:$0xff]  ;;  %v251_v36 = vld [vmem:[%s820_s2 + $0x58] sm:$0xff] }
  0x19   :  { %v375_v37 = vld [vmem:[%s821_s3 + $0x38] sm:$0xff]  ;;  %v252_v38 = vld [vmem:[%s820_s2 + $0x60] sm:$0xff]  ;;  %v253_v40 = vld [vmem:[%s820_s2 + $0x68] sm:$0xff] }
  0x1a   :  { %107 = vperm.xlu1 %524, %v37_v9   ;;  %193 = vperm.xlu0 %525, %v37_v9   ;;  %v376_v39 = vld [vmem:[%s821_s3 + $0x40] sm:$0xff]  ;;  %v377_v41 = vld [vmem:[%s821_s3 + $0x48] sm:$0xff]  ;;  %v254_v42 = vld [vmem:[%s820_s2 + $0x70] sm:$0xff] }
  0x1b   :  { %v378_v43 = vld [vmem:[%s821_s3 + $0x50] sm:$0xff]  ;;  %v255_v44 = vld [vmem:[%s820_s2 + $0x78] sm:$0xff]  ;;  %v380_v47 = vld [vmem:[%s821_s3 + $0x60] sm:$0xff] }
  0x1c   :  { %v379_v45 = vld [vmem:[%s821_s3 + $0x58] sm:$0xff]  ;;  %v382_v46 = vld [vmem:[%s821_s3 + $0x70] sm:$0xff]  ;;  %v381_v50 = vld [vmem:[%s821_s3 + $0x68] sm:$0xff] }
  0x1d   :  { %v730_v51 = vld [vmem:[%s818_s0 + $0x1] ss:$0 sm:$0xff]  ;;  %v735_v52 = vld [vmem:[%s818_s0] ss:$0 sm:$0xff]  ;;  %v383_v55 = vld [vmem:[%s821_s3 + $0x78] sm:$0xff] }
  0x1e   :  { %117 = vperm.xlu1 %524, %v39_v10   ;;  %201 = vperm.xlu0 %525, %v39_v10  }
  0x22   :  { %526 = vset.pattern.permute.xlu1 %v551_v2  ;;  %527 = vset.pattern.permute.xlu0 %v552_v3 }
  0x23   :  { %145 = vperm.xlu1 %526, %v25_v11   ;;  %42 = vperm.xlu0 %527, %v24_v1  }
  0x27   :  { %149 = vperm.xlu1 %526, %v26_v0   ;;  %47 = vperm.xlu0 %527, %v25_v11  }
  0x2b   :  { %157 = vperm.xlu1 %526, %v28_v12   ;;  %62 = vperm.xlu0 %527, %v28_v12  }
  0x2f   :  { %165 = vperm.xlu1 %526, %v30_v13   ;;  %72 = vperm.xlu0 %527, %v30_v13  }
  0x33   :  { %173 = vperm.xlu1 %526, %v32_v14   ;;  %82 = vperm.xlu0 %527, %v32_v14  }
  0x37   :  { %181 = vperm.xlu1 %526, %v34_v15   ;;  %92 = vperm.xlu0 %527, %v34_v15  }
  0x3b   :  { %189 = vperm.xlu1 %526, %v36_v16   ;;  %102 = vperm.xlu0 %527, %v36_v16  }
  0x3f   :  { %197 = vperm.xlu1 %526, %v38_v17   ;;  %112 = vperm.xlu0 %527, %v38_v17  }
  0x43   :  { %528 = vset.pattern.permute.xlu1 %v552_v3  ;;  %263 = vperm.xlu0 %527, %v241_v18  }
  0x44   :  { %258 = vperm.xlu1 %528, %v240_v19  }
  0x47   :  { %278 = vperm.xlu0 %527, %v244_v20  }
  0x48   :  { %268 = vperm.xlu1 %528, %v242_v21  }
  0x4b   :  { %391 = vperm.xlu0 %527, %v369_v22  }
  0x4c   :  { %273 = vperm.xlu1 %528, %v243_v23  }
  0x4f   :  { %283 = vperm.xlu0 %527, %v245_v24  }
  0x50   :  { %386 = vperm.xlu1 %528, %v368_v25  }
  0x53   :  { %288 = vperm.xlu0 %527, %v246_v26  }
  0x54   :  { %396 = vperm.xlu1 %528, %v370_v27  }
  0x57   :  { %293 = vperm.xlu0 %527, %v247_v28  }
  0x58   :  { %401 = vperm.xlu1 %528, %v371_v29  }
  0x5b   :  { %298 = vperm.xlu0 %527, %v248_v30  }
  0x5c   :  { %406 = vperm.xlu1 %528, %v372_v31  }
  0x5f   :  { %303 = vperm.xlu0 %527, %v249_v32  }
  0x60   :  { %411 = vperm.xlu1 %528, %v373_v33  }
  0x63   :  { %308 = vperm.xlu0 %527, %v250_v34  }
  0x64   :  { %416 = vperm.xlu1 %528, %v374_v35  }
  0x67   :  { %313 = vperm.xlu0 %527, %v251_v36  }
  0x68   :  { %421 = vperm.xlu1 %528, %v375_v37  }
  0x6b   :  { %318 = vperm.xlu0 %527, %v252_v38  }
  0x6c   :  { %426 = vperm.xlu1 %528, %v376_v39  }
  0x6f   :  { %323 = vperm.xlu0 %527, %v253_v40  }
  0x70   :  { %431 = vperm.xlu1 %528, %v377_v41  }
  0x73   :  { %328 = vperm.xlu0 %527, %v254_v42  }
  0x74   :  { %436 = vperm.xlu1 %528, %v378_v43  }
  0x77   :  { %333 = vperm.xlu0 %527, %v255_v44  }
  0x78   :  { %441 = vperm.xlu1 %528, %v379_v45  }
  0x7b   :  { %456 = vperm.xlu0 %527, %v382_v46  }
  0x7c   :  { %446 = vperm.xlu1 %528, %v380_v47  }
  0x7d   :  { %v722_v48 = vpop.permute.xlu1 %52  ;;  %v142_v49 = vpop.permute.xlu0 %141 }
  0x7e   :  { %v208_v44 = vmul.f32 %v730_v51, %v142_v49 }
  0x80   :  { %451 = vperm.xlu1 %528, %v381_v50  }
  0x81   :  { %v58_v53 = vpop.permute.xlu1 %57  ;;  %v154_v54 = vpop.permute.xlu0 %153 }
  0x82   :  { %v127_v56 = vmul.f32 %v735_v52, %v58_v53  ;;  %v211_v57 = vmul.f32 %v730_v51, %v154_v54 }
  0x84   :  { %461 = vperm.xlu1 %528, %v383_v55   ;;  %v742_v58 = vadd.f32 %v211_v57, %v127_v56  ;;  %v126_v55 = vmul.f32 %v735_v52, %v722_v48 }
  0x85   :  { %v68_v59 = vpop.permute.xlu1 %67  ;;  %v162_v60 = vpop.permute.xlu0 %161 }
  0x86   :  { %v129_v61 = vmul.f32 %v735_v52, %v68_v59  ;;  %v213_v62 = vmul.f32 %v730_v51, %v162_v60 }
  0x88   :  { %v746_v63 = vadd.f32 %v213_v62, %v129_v61 }
  0x89   :  { %v78_v0 = vpop.permute.xlu1 %77  ;;  %v170_v1 = vpop.permute.xlu0 %169 }
  0x8a   :  { %v131_v2 = vmul.f32 %v735_v52, %v78_v0  ;;  %v215_v3 = vmul.f32 %v730_v51, %v170_v1 }
  0x8c   :  { %v750_v4 = vadd.f32 %v215_v3, %v131_v2 }
  0x8d   :  { %v88_v5 = vpop.permute.xlu1 %87  ;;  %v178_v6 = vpop.permute.xlu0 %177 }
  0x8e   :  { %v133_v7 = vmul.f32 %v735_v52, %v88_v5  ;;  %v217_v8 = vmul.f32 %v730_v51, %v178_v6 }
  0x90   :  { %v754_v9 = vadd.f32 %v217_v8, %v133_v7 }
  0x91   :  { %v98_v10 = vpop.permute.xlu1 %97  ;;  %v186_v11 = vpop.permute.xlu0 %185 }
  0x92   :  { %v135_v12 = vmul.f32 %v735_v52, %v98_v10  ;;  %v219_v13 = vmul.f32 %v730_v51, %v186_v11 }
  0x94   :  { %v758_v14 = vadd.f32 %v219_v13, %v135_v12 }
  0x95   :  { %v108_v15 = vpop.permute.xlu1 %107  ;;  %v194_v16 = vpop.permute.xlu0 %193 }
  0x96   :  { %v137_v17 = vmul.f32 %v735_v52, %v108_v15  ;;  %v221_v18 = vmul.f32 %v730_v51, %v194_v16 }
  0x98   :  { %v762_v19 = vadd.f32 %v221_v18, %v137_v17 }
  0x99   :  { %v118_v20 = vpop.permute.xlu1 %117  ;;  %v202_v21 = vpop.permute.xlu0 %201 }
  0x9a   :  { %v139_v22 = vmul.f32 %v735_v52, %v118_v20  ;;  %v223_v23 = vmul.f32 %v730_v51, %v202_v21 }
  0x9c   :  { %v766_v24 = vadd.f32 %v223_v23, %v139_v22 }
  0x9e   :  { %v146_v25 = vpop.permute.xlu1 %145  ;;  %v43_v26 = vpop.permute.xlu0 %42 }
  0x9f   :  { %v124_v43 = vmul.f32 %v735_v52, %v43_v26  ;;  %v209_v50 = vmul.f32 %v730_v51, %v146_v25 }
  0xa1   :  { %v224_v54 = vadd.f32 %v208_v44, %v124_v43 }
  0xa2   :  { %v150_v27 = vpop.permute.xlu1 %149  ;;  %v48_v28 = vpop.permute.xlu0 %47 }
  0xa3   :  { %v125_v45 = vmul.f32 %v735_v52, %v48_v28  ;;  %v210_v53 = vmul.f32 %v730_v51, %v150_v27 }
  0xa5   :  { %v225_v56 = vadd.f32 %v209_v50, %v125_v45  ;;  %v226_v62 = vadd.f32 %v210_v53, %v126_v55 }
  0xa6   :  { %v158_v29 = vpop.permute.xlu1 %157  ;;  %v63_v30 = vpop.permute.xlu0 %62 }
  0xa7   :  { %v212_v3 = vmul.f32 %v730_v51, %v158_v29  ;;  %v128_v5 = vmul.f32 %v735_v52, %v63_v30 }
  0xa9   :  { %v228_v13 = vadd.f32 %v212_v3, %v128_v5 }
  0xaa   :  { %v166_v31 = vpop.permute.xlu1 %165  ;;  %v73_v32 = vpop.permute.xlu0 %72 }
  0xab   :  { %v214_v23 = vmul.f32 %v730_v51, %v166_v31  ;;  %v130_v25 = vmul.f32 %v735_v52, %v73_v32 }
  0xae   :  { %v174_v33 = vpop.permute.xlu1 %173  ;;  %v83_v34 = vpop.permute.xlu0 %82 }
  0xaf   :  { %v132_v50 = vmul.f32 %v735_v52, %v83_v34 }
  0xb2   :  { %v768_v35 = vpop.permute.xlu1 %181  ;;  %v770_v36 = vpop.permute.xlu0 %92 }
  0xb6   :  { %v772_v37 = vpop.permute.xlu1 %189  ;;  %v774_v38 = vpop.permute.xlu0 %102 }
  0xba   :  { %v776_v39 = vpop.permute.xlu1 %197  ;;  %v778_v40 = vpop.permute.xlu0 %112 }
  0xbe   :  { %v264_v41 = vpop.permute.xlu0 %263 }
  0xbf   :  { %v259_v42 = vpop.permute.xlu1 %258  ;;  %v337_v61 = vadd.f32 %v264_v41, %v225_v56  ;;  %v230_v41 = vadd.f32 %v214_v23, %v130_v25  ;;  %v222_v23 = vmul.f32 %v730_v51, %v776_v39  ;;  %v138_v25 = vmul.f32 %v735_v52, %v778_v40 }
  0xc0   :  { %v336_v57 = vadd.f32 %v259_v42, %v224_v54 }
  0xc1   :  { %v353_v6 = vmax.f32 %v337_v61, 0.0 }
  0xc2   :  { %v279_v46 = vpop.permute.xlu0 %278  ;;  %v352_v0 = vmax.f32 %v336_v57, 0.0 }
  0xc3   :  { %v269_v47 = vpop.permute.xlu1 %268  ;;  %v340_v17 = vadd.f32 %v279_v46, %v228_v13 }
  0xc4   :  { %v338_v49 = vadd.f32 %v269_v47, %v226_v62  ;;  %v216_v47 = vmul.f32 %v730_v51, %v174_v33  ;;  %v134_v33 = vmul.f32 %v735_v52, %v770_v36  ;;  %v136_v36 = vmul.f32 %v735_v52, %v774_v38 }
  0xc5   :  { %v356_v27 = vmax.f32 %v340_v17, 0.0 }
  0xc6   :  { %v392_v59 = vpop.permute.xlu0 %391  ;;  %v354_v8 = vmax.f32 %v338_v49, 0.0  ;;  %v232_v57 = vadd.f32 %v216_v47, %v132_v50  ;;  %v218_v49 = vmul.f32 %v730_v51, %v768_v35  ;;  %v220_v35 = vmul.f32 %v730_v51, %v772_v37 }
  0xc7   :  { %v274_v60 = vpop.permute.xlu1 %273  ;;  %v465_v10 = vmul.f32 %v392_v59, %v353_v6 }
  0xc8   :  { %v339_v48 = vadd.f32 %v274_v60, %v742_v58 }
  0xca   :  { %v284_v1 = vpop.permute.xlu0 %283  ;;  %v355_v18 = vmax.f32 %v339_v48, 0.0 }
  0xcb   :  { %v387_v2 = vpop.permute.xlu1 %386  ;;  %v341_v28 = vadd.f32 %v284_v1, %v746_v63 }
  0xcc   :  { %v464_v7 = vmul.f32 %v387_v2, %v352_v0 }
  0xcd   :  { %v357_v43 = vmax.f32 %v341_v28, 0.0 }
  0xce   :  { %v289_v11 = vpop.permute.xlu0 %288  ;;  %v480_v15 = vadd.f32 %v465_v10, %v464_v7  ;;  %v234_v7 = vadd.f32 %v218_v49, %v134_v33 }
  0xcf   :  { %v397_v12 = vpop.permute.xlu1 %396  ;;  %v342_v44 = vadd.f32 %v289_v11, %v230_v41 }
  0xd0   :  { %v466_v16 = vmul.f32 %v397_v12, %v354_v8 }
  0xd1   :  { %v358_v32 = vmax.f32 %v342_v44, 0.0 }
  0xd2   :  { %v481_v20 = vadd.f32 %v480_v15, %v466_v16  ;;  %v294_v21 = vpop.permute.xlu0 %293 }
  0xd3   :  { %v402_v22 = vpop.permute.xlu1 %401  ;;  %v343_v54 = vadd.f32 %v294_v21, %v750_v4  ;;  %v236_v21 = vadd.f32 %v220_v35, %v136_v36 }
  0xd4   :  { %v467_v26 = vmul.f32 %v402_v22, %v355_v18 }
  0xd5   :  { %v359_v60 = vmax.f32 %v343_v54, 0.0 }
  0xd6   :  { %v482_v29 = vadd.f32 %v481_v20, %v467_v26  ;;  %v299_v58 = vpop.permute.xlu0 %298 }
  0xd7   :  { %v407_v30 = vpop.permute.xlu1 %406  ;;  %v344_v61 = vadd.f32 %v299_v58, %v232_v57 }
  0xd8   :  { %v468_v42 = vmul.f32 %v407_v30, %v356_v27  ;;  %v238_v30 = vadd.f32 %v222_v23, %v138_v25 }
  0xd9   :  { %v360_v2 = vmax.f32 %v344_v61, 0.0 }
  0xda   :  { %v304_v45 = vpop.permute.xlu0 %303  ;;  %v483_v31 = vadd.f32 %v482_v29, %v468_v42 }
  0xdb   :  { %v412_v46 = vpop.permute.xlu1 %411  ;;  %v345_v4 = vadd.f32 %v304_v45, %v754_v9 }
  0xdc   :  { %v469_v53 = vmul.f32 %v412_v46, %v357_v43 }
  0xdd   :  { %v361_v10 = vmax.f32 %v345_v4, 0.0 }
  0xde   :  { %v484_v55 = vadd.f32 %v483_v31, %v469_v53  ;;  %v309_v63 = vpop.permute.xlu0 %308 }
  0xdf   :  { %v417_v56 = vpop.permute.xlu1 %416  ;;  %v346_v48 = vadd.f32 %v309_v63, %v234_v7 }
  0xe0   :  { %v470_v59 = vmul.f32 %v417_v56, %v358_v32 }
  0xe1   :  { %v362_v16 = vmax.f32 %v346_v48, 0.0 }
  0xe2   :  { %v314_v62 = vpop.permute.xlu0 %313  ;;  %v485_v34 = vadd.f32 %v484_v55, %v470_v59 }
  0xe3   :  { %v422_v0 = vpop.permute.xlu1 %421  ;;  %v347_v9 = vadd.f32 %v314_v62, %v758_v14 }
  0xe4   :  { %v471_v1 = vmul.f32 %v422_v0, %v359_v60 }
  0xe5   :  { %v363_v37 = vmax.f32 %v347_v9, 0.0 }
  0xe6   :  { %v486_v3 = vadd.f32 %v485_v34, %v471_v1  ;;  %v319_v5 = vpop.permute.xlu0 %318 }
  0xe7   :  { %v427_v6 = vpop.permute.xlu1 %426  ;;  %v348_v26 = vadd.f32 %v319_v5, %v236_v21 }
  0xe8   :  { %v472_v8 = vmul.f32 %v427_v6, %v360_v2 }
  0xe9   :  { %v364_v58 = vmax.f32 %v348_v26, 0.0 }
  0xea   :  { %v324_v11 = vpop.permute.xlu0 %323  ;;  %v487_v13 = vadd.f32 %v486_v3, %v472_v8 }
  0xeb   :  { %v432_v12 = vpop.permute.xlu1 %431  ;;  %v349_v14 = vadd.f32 %v324_v11, %v762_v19 }
  0xec   :  { %v473_v15 = vmul.f32 %v432_v12, %v361_v10 }
  0xed   :  { %v365_v45 = vmax.f32 %v349_v14, 0.0 }
  0xee   :  { %v488_v17 = vadd.f32 %v487_v13, %v473_v15  ;;  %v329_v18 = vpop.permute.xlu0 %328 }
  0xef   :  { %v437_v20 = vpop.permute.xlu1 %436  ;;  %v350_v43 = vadd.f32 %v329_v18, %v238_v30 }
  0xf0   :  { %v474_v22 = vmul.f32 %v437_v20, %v362_v16 }
  0xf1   :  { %v366_v52 = vmax.f32 %v350_v43, 0.0 }
  0xf2   :  { %v489_v38 = vadd.f32 %v488_v17, %v474_v22  ;;  %v334_v29 = vpop.permute.xlu0 %333 }
  0xf3   :  { %v442_v27 = vpop.permute.xlu1 %441  ;;  %v351_v51 = vadd.f32 %v334_v29, %v766_v24  ;;  %v502_v24 = vstv %s822_s4 }
  0xf4   :  { %v475_v28 = vmul.f32 %v442_v27, %v363_v37 }
  0xf5   :  { %v367_v50 = vmax.f32 %v351_v51, 0.0 }
  0xf6   :  { %v490_v41 = vadd.f32 %v489_v38, %v475_v28  ;;  %v457_v39 = vpop.permute.xlu0 %456 }
  0xf7   :  { %v447_v42 = vpop.permute.xlu1 %446  ;;  %v478_v31 = vmul.f32 %v457_v39, %v366_v52 }
  0xf8   :  { %v476_v44 = vmul.f32 %v447_v42, %v364_v58 }
  0xfa   :  { %v491_v40 = vadd.f32 %v490_v41, %v476_v44 }
  0xfb   :  { %v452_v46 = vpop.permute.xlu1 %451 }
  0xfc   :  { %v477_v47 = vmul.f32 %v452_v46, %v365_v45 }
  0xfe   :  { %v492_v53 = vadd.f32 %v491_v40, %v477_v47 }
  0xff   :  { %v462_v32 = vpop.permute.xlu1 %461 }
 0x100   :  { %v479_v54 = vmul.f32 %v462_v32, %v367_v50  ;;  %v493_v55 = vadd.f32 %v492_v53, %v478_v31 }
 0x102   :  { %v494_v19 = vadd.f32 %v493_v55, %v479_v54 }
 0x104   :  { %v495_v63 = vrot.slane %v494_v19, 4 }
 0x106   :  { %v496_v56 = vadd.f32 %v495_v63, %v494_v19 }
 0x108   :  { %v497_v57 = vrot.slane %v496_v56, 2 }
 0x10a   :  { %v498_v59 = vadd.f32 %v497_v57, %v496_v56 }
 0x10c   :  { %v499_v60 = vrot.slane %v498_v59, 1 }
 0x10e   :  { %v500_v61 = vadd.f32 %v499_v60, %v498_v59 }
 0x110   :  { %v503_v62 = vadd.f32 %v502_v24, %v500_v61 }
 0x112   :  { %504 = vst [vmem:[#allocation3] sm:$0x1] %v503_v62 }
 0x113   :  { %540 = shalt.err (!%p537_p4)
}
 0x114   :  { %514 = dma.vmem_to_hbm [thread:$0]  %s512_s15, 16, %s823_s5, [#allocation4]  }
 0x115   :  { %549 = dma.done.wait [#allocation4], 16  }
 0x116   :  { %550 = vsyncadd [#allocation4], 4294967280 }
 0x117   :  { %518 = vsyncpa [#allocation4], 1 }

</bundles_post_ra>
